<compile_context>
chip_gen: v6e
topology: v6e:2x2x1
jax: 0.10.0
libtpu: 0.0.40
codegen_flags: <defaults>
</compile_context>

<pallas_src>
import jax
import jax.numpy as jnp
from jax.experimental import pallas as pl
from jax.experimental.pallas import tpu as pltpu


def _stacked_lstm_kernel(x_ref, w_ref, b_ref, pc_ref, ph_ref, nc_ref, nh_ref):
    """Whole stacked cell in one grid step; layers unrolled at trace time.

    x_ref  : (B, S)        f32   initial layer input
    w_ref  : (L, 2S, 4S)   bf16  per layer: [W_ih ; W_hh]^T, MXU-friendly (K, N)
    b_ref  : (L, 1, 4S)    f32   per layer: b_ih + b_hh
    pc_ref : (L, B, S)           prev_c list (fed to LSTMCell as h0 — module quirk)
    ph_ref : (L, B, S)           prev_h list (fed to LSTMCell as c0 — module quirk)
    nc_ref : (L, B, S)           next_c list (= LSTM h1 — module quirk)
    nh_ref : (L, B, S)           next_h list (= LSTM c1 — module quirk)
    """
    L, B, S = pc_ref.shape

    x = x_ref[...].astype(jnp.float32)                       # (B, S) layer input
    for l in range(L):                                        # static unroll (L small)
        h0 = pc_ref[l].astype(jnp.float32)                    # (B, S)
        c0 = ph_ref[l].astype(jnp.float32)                    # (B, S)

        # Fused input/hidden matmul: [x, h0] @ [W_ih ; W_hh]^T + (b_ih + b_hh)
        lhs = jnp.concatenate([x, h0], axis=-1).astype(jnp.bfloat16)      # (B, 2S)
        gates = (jnp.dot(lhs, w_ref[l], preferred_element_type=jnp.float32)
                 + b_ref[l])                                              # (B, 4S)

        # torch.nn.LSTMCell gate order: i, f, g, o
        # TODO(synk): at S < 128 these lane-slices are sub-vreg extractions;
        # if S grows, pad S to 128 so each gate section starts at a lane boundary.
        i_g = jax.nn.sigmoid(gates[:, 0 * S:1 * S])
        f_g = jax.nn.sigmoid(gates[:, 1 * S:2 * S])
        g_g = jnp.tanh(gates[:, 2 * S:3 * S])
        o_g = jax.nn.sigmoid(gates[:, 3 * S:4 * S])

        c1 = f_g * c0 + i_g * g_g                  # LSTM new cell state
        h1 = o_g * jnp.tanh(c1)                    # LSTM new hidden state

        nc_ref[l] = h1.astype(nc_ref.dtype)        # module's curr_c  (= h1)
        nh_ref[l] = c1.astype(nh_ref.dtype)        # module's curr_h  (= c1)

        # inputs = curr_h[-1].view(1, -1); with B == 1 (enforced) this is c1.
        x = c1


def prepare_params(w_ih, w_hh, b_ih, b_hh):
    """One-time parameter repack — call at init, NOT on the per-step path.

    w_ih, w_hh : (L, 4S, S)  (torch LSTMCell layout) ; b_ih, b_hh : (L, 4S)
    returns w  : (L, 2S, 4S) bf16  fused+transposed weight  ([W_ih ; W_hh]^T)
            b  : (L, 1, 4S)  f32   fused bias (b_ih + b_hh)
    """
    L, G, S = w_ih.shape
    w = jnp.concatenate([w_ih, w_hh], axis=-1)               # (L, 4S, 2S)
    w = jnp.transpose(w, (0, 2, 1)).astype(jnp.bfloat16)     # (L, 2S, 4S)
    b = (b_ih + b_hh).reshape(L, 1, G).astype(jnp.float32)   # (L, 1, 4S)
    return w, b


@jax.jit
def stacked_lstm_cell(inputs, prev_c, prev_h, w, b):
    """
    inputs : (1, S)   — batch must be 1 (the module's .view(1, -1) implies it)
    prev_c, prev_h : (L, B, S) stacked hidden-state lists
    w, b   : outputs of prepare_params()
    returns (next_c, next_h), each stacked (L, B, S); next_c[i] == list element i.
    """
    L, B, S = prev_c.shape
    if B != 1:
        raise ValueError("StackedLSTMCell forward implies batch == 1 "
                         "(inputs = curr_h[-1].view(1, -1)).")
    assert inputs.shape == (B, S)
    assert w.shape == (L, 2 * S, 4 * S) and b.shape == (L, 1, 4 * S)

    def full(*shape):
        return pl.BlockSpec(shape, lambda i: (0,) * len(shape))

    grid_spec = pltpu.PrefetchScalarGridSpec(
        num_scalar_prefetch=0,
        grid=(1,),                                 # single step; layers unroll inside
        in_specs=[
            full(B, S),                            # inputs
            full(L, 2 * S, 4 * S),                 # fused weights (bf16)
            full(L, 1, 4 * S),                     # fused bias
            full(L, B, S),                         # prev_c
            full(L, B, S),                         # prev_h
        ],
        out_specs=[
            full(L, B, S),                         # next_c
            full(L, B, S),                         # next_h
        ],
    )
    # TODO(synk): for large S (~>=1K) add K/N tiling for the weight BlockSpecs and
    # set vmem_limit_bytes explicitly so the weight slab fits v7x's 64 MiB VMEM.

    return pl.pallas_call(
        _stacked_lstm_kernel,
        grid_spec=grid_spec,
        out_shape=(jax.ShapeDtypeStruct((L, B, S), inputs.dtype),
                   jax.ShapeDtypeStruct((L, B, S), inputs.dtype)),
        compiler_params=pltpu.CompilerParams(
            dimension_semantics=("arbitrary",)),   # carried layer input → sequential
    )(inputs, w, b, prev_c, prev_h)


def _reference(inputs, prev_c, prev_h, w_ih, w_hh, b_ih, b_hh):
    """Pure-JAX replica of the PyTorch forward (same quirky arg order).

    Operands are rounded to bf16 exactly as in the kernel so the comparison is
    apples-to-apples (accumulation stays f32)."""
    L = prev_c.shape[0]
    x = inputs
    nc, nh = [], []
    for i in range(L):
        h0, c0 = prev_c[i], prev_h[i]          # module quirk: (prev_c, prev_h) -> (h0, c0)
        S = h0.shape[-1]
        lhs = jnp.concatenate([x, h0], axis=-1).astype(jnp.bfloat16).astype(jnp.float32)
        wcat = jnp.concatenate([w_ih[i], w_hh[i]], axis=-1)
        wcat = wcat.astype(jnp.bfloat16).astype(jnp.float32)
        gates = lhs @ wcat.T + (b_ih[i] + b_hh[i])
        ig = jax.nn.sigmoid(gates[:, 0 * S:1 * S])
        fg = jax.nn.sigmoid(gates[:, 1 * S:2 * S])
        gg = jnp.tanh(gates[:, 2 * S:3 * S])
        og = jax.nn.sigmoid(gates[:, 3 * S:4 * S])
        c1 = fg * c0 + ig * gg
        h1 = og * jnp.tanh(c1)
        nc.append(h1)                          # curr_c (= h1)
        nh.append(c1)                          # curr_h (= c1)
        x = c1[-1].reshape(1, -1)
    return jnp.stack(nc), jnp.stack(nh)


if __name__ == "__main__":
    LAYERS, SIZE, BATCH = 2, 32, 1   # batch=1 implied by `.view(1, -1)` in forward

    key = jax.random.PRNGKey(0)
    ks = jax.random.split(key, 7)
    bound = 1.0 / jnp.sqrt(SIZE)     # PyTorch LSTMCell default uniform init range

    w_ih = jax.random.uniform(ks[0], (LAYERS, 4 * SIZE, SIZE), jnp.float32, -bound, bound)
    w_hh = jax.random.uniform(ks[1], (LAYERS, 4 * SIZE, SIZE), jnp.float32, -bound, bound)
    b_ih = jax.random.uniform(ks[2], (LAYERS, 4 * SIZE), jnp.float32, -bound, bound)
    b_hh = jax.random.uniform(ks[3], (LAYERS, 4 * SIZE), jnp.float32, -bound, bound)

    inputs = jax.random.normal(ks[4], (BATCH, SIZE), jnp.float32)
    prev_c = jax.random.normal(ks[5], (LAYERS, BATCH, SIZE), jnp.float32)
    prev_h = jax.random.normal(ks[6], (LAYERS, BATCH, SIZE), jnp.float32)

    w, b = prepare_params(w_ih, w_hh, b_ih, b_hh)          # one-time repack
    next_c, next_h = stacked_lstm_cell(inputs, prev_c, prev_h, w, b)
    jax.block_until_ready(next_c)
    jax.block_until_ready(next_h)

    ref_c, ref_h = _reference(inputs, prev_c, prev_h, w_ih, w_hh, b_ih, b_hh)
    assert jnp.allclose(next_c, ref_c, rtol=1e-3, atol=1e-3), "next_c mismatch vs reference"
    assert jnp.allclose(next_h, ref_h, rtol=1e-3, atol=1e-3), "next_h mismatch vs reference"

    print("KERNEL_OK")
</pallas_src>

<mosaic_0001>
module attributes {stable_mosaic.version = 11 : i64} {
  func.func @_stacked_lstm_kernel(%arg0: i32, %arg1: memref<1x32xf32, #tpu.memory_space<vmem>>, %arg2: memref<2x64x128xbf16, #tpu.memory_space<vmem>>, %arg3: memref<2x1x128xf32, #tpu.memory_space<vmem>>, %arg4: memref<2x1x32xf32, #tpu.memory_space<vmem>>, %arg5: memref<2x1x32xf32, #tpu.memory_space<vmem>>, %arg6: memref<2x1x32xf32, #tpu.memory_space<vmem>>, %arg7: memref<2x1x32xf32, #tpu.memory_space<vmem>>) attributes {dimension_semantics = [#tpu.dimension_semantics<arbitrary>], iteration_bounds = array<i64: 1>, scalar_prefetch = 0 : i64, scratch_operands = 0 : i64, tpu.core_type = #tpu.core_type<tc>, window_params = [{pipeline_mode = #tpu.pipeline_mode<synchronous>, transform_indices = @transform_0, window_bounds = array<i64: 1, 32>}, {pipeline_mode = #tpu.pipeline_mode<synchronous>, transform_indices = @transform_1, window_bounds = array<i64: 2, 64, 128>}, {pipeline_mode = #tpu.pipeline_mode<synchronous>, transform_indices = @transform_2, window_bounds = array<i64: 2, 1, 128>}, {pipeline_mode = #tpu.pipeline_mode<synchronous>, transform_indices = @transform_3, window_bounds = array<i64: 2, 1, 32>}, {pipeline_mode = #tpu.pipeline_mode<synchronous>, transform_indices = @transform_4, window_bounds = array<i64: 2, 1, 32>}, {pipeline_mode = #tpu.pipeline_mode<synchronous>, transform_indices = @transform_5, window_bounds = array<i64: 2, 1, 32>}, {pipeline_mode = #tpu.pipeline_mode<synchronous>, transform_indices = @transform_6, window_bounds = array<i64: 2, 1, 32>}]} {
    %c0 = arith.constant 0 : index
    %c0_0 = arith.constant 0 : index
    %0 = vector.load %arg1[%c0, %c0_0] : memref<1x32xf32, #tpu.memory_space<vmem>>, vector<1x32xf32>
    %c0_1 = arith.constant 0 : index
    %c0_2 = arith.constant 0 : index
    %c0_3 = arith.constant 0 : index
    %1 = vector.load %arg4[%c0_1, %c0_2, %c0_3] : memref<2x1x32xf32, #tpu.memory_space<vmem>>, vector<1x1x32xf32>
    %2 = vector.shape_cast %1 : vector<1x1x32xf32> to vector<1x32xf32>
    %c0_4 = arith.constant 0 : index
    %c0_5 = arith.constant 0 : index
    %c0_6 = arith.constant 0 : index
    %3 = vector.load %arg5[%c0_4, %c0_5, %c0_6] : memref<2x1x32xf32, #tpu.memory_space<vmem>>, vector<1x1x32xf32>
    %4 = vector.shape_cast %3 : vector<1x1x32xf32> to vector<1x32xf32>
    %5 = tpu.concatenate %0, %2 in 1 : vector<1x32xf32>, vector<1x32xf32> -> vector<1x64xf32>
    %6 = arith.truncf %5 : vector<1x64xf32> to vector<1x64xbf16>
    %c0_7 = arith.constant 0 : index
    %c0_8 = arith.constant 0 : index
    %c0_9 = arith.constant 0 : index
    %7 = vector.load %arg2[%c0_7, %c0_8, %c0_9] : memref<2x64x128xbf16, #tpu.memory_space<vmem>>, vector<1x64x128xbf16>
    %8 = vector.shape_cast %7 : vector<1x64x128xbf16> to vector<64x128xbf16>
    %cst = arith.constant dense<0.000000e+00> : vector<1x128xf32>
    %9 = tpu.matmul %6, %8, %cst {dimension_numbers = #tpu.dot_dimension_numbers<[1], [0], [0], [1], [0, 0, 1, 1], [], []>} : vector<1x64xbf16>, vector<64x128xbf16>, vector<1x128xf32> -> vector<1x128xf32>
    %c0_10 = arith.constant 0 : index
    %c0_11 = arith.constant 0 : index
    %c0_12 = arith.constant 0 : index
    %10 = vector.load %arg3[%c0_10, %c0_11, %c0_12] : memref<2x1x128xf32, #tpu.memory_space<vmem>>, vector<1x1x128xf32>
    %11 = vector.shape_cast %10 : vector<1x1x128xf32> to vector<1x128xf32>
    %12 = arith.addf %9, %11 : vector<1x128xf32>
    %13 = vector.extract_strided_slice %12 {offsets = [0, 0], sizes = [1, 32], strides = [1, 1]} : vector<1x128xf32> to vector<1x32xf32>
    %14 = arith.negf %13 : vector<1x32xf32>
    %15 = math.exp %14 : vector<1x32xf32>
    %cst_13 = arith.constant 1.000000e+00 : f32
    %16 = vector.broadcast %cst_13 : f32 to vector<1x32xf32>
    %17 = arith.addf %16, %15 : vector<1x32xf32>
    %18 = arith.divf %16, %17 : vector<1x32xf32>
    %19 = vector.extract_strided_slice %12 {offsets = [0, 32], sizes = [1, 32], strides = [1, 1]} : vector<1x128xf32> to vector<1x32xf32>
    %20 = arith.negf %19 : vector<1x32xf32>
    %21 = math.exp %20 : vector<1x32xf32>
    %cst_14 = arith.constant 1.000000e+00 : f32
    %22 = vector.broadcast %cst_14 : f32 to vector<1x32xf32>
    %23 = arith.addf %22, %21 : vector<1x32xf32>
    %24 = arith.divf %22, %23 : vector<1x32xf32>
    %25 = vector.extract_strided_slice %12 {offsets = [0, 64], sizes = [1, 32], strides = [1, 1]} : vector<1x128xf32> to vector<1x32xf32>
    %26 = math.tanh %25 : vector<1x32xf32>
    %27 = vector.extract_strided_slice %12 {offsets = [0, 96], sizes = [1, 32], strides = [1, 1]} : vector<1x128xf32> to vector<1x32xf32>
    %28 = arith.negf %27 : vector<1x32xf32>
    %29 = math.exp %28 : vector<1x32xf32>
    %cst_15 = arith.constant 1.000000e+00 : f32
    %30 = vector.broadcast %cst_15 : f32 to vector<1x32xf32>
    %31 = arith.addf %30, %29 : vector<1x32xf32>
    %32 = arith.divf %30, %31 : vector<1x32xf32>
    %33 = arith.mulf %24, %4 : vector<1x32xf32>
    %34 = arith.mulf %18, %26 : vector<1x32xf32>
    %35 = arith.addf %33, %34 : vector<1x32xf32>
    %36 = math.tanh %35 : vector<1x32xf32>
    %37 = arith.mulf %32, %36 : vector<1x32xf32>
    %c0_16 = arith.constant 0 : index
    %c0_17 = arith.constant 0 : index
    %c0_18 = arith.constant 0 : index
    %38 = vector.load %arg6[%c0_16, %c0_17, %c0_18] : memref<2x1x32xf32, #tpu.memory_space<vmem>>, vector<1x1x32xf32>
    %39 = vector.shape_cast %38 : vector<1x1x32xf32> to vector<1x32xf32>
    %40 = vector.shape_cast %37 : vector<1x32xf32> to vector<1x1x32xf32>
    tpu.vector_store %arg6[%c0_16, %c0_17, %c0_18], %40 {strides = array<i32>} : memref<2x1x32xf32, #tpu.memory_space<vmem>>, vector<1x1x32xf32>,
    %c0_19 = arith.constant 0 : index
    %c0_20 = arith.constant 0 : index
    %c0_21 = arith.constant 0 : index
    %41 = vector.load %arg7[%c0_19, %c0_20, %c0_21] : memref<2x1x32xf32, #tpu.memory_space<vmem>>, vector<1x1x32xf32>
    %42 = vector.shape_cast %41 : vector<1x1x32xf32> to vector<1x32xf32>
    %43 = vector.shape_cast %35 : vector<1x32xf32> to vector<1x1x32xf32>
    tpu.vector_store %arg7[%c0_19, %c0_20, %c0_21], %43 {strides = array<i32>} : memref<2x1x32xf32, #tpu.memory_space<vmem>>, vector<1x1x32xf32>,
    %c1 = arith.constant 1 : index
    %c0_22 = arith.constant 0 : index
    %c0_23 = arith.constant 0 : index
    %44 = vector.load %arg4[%c1, %c0_22, %c0_23] : memref<2x1x32xf32, #tpu.memory_space<vmem>>, vector<1x1x32xf32>
    %45 = vector.shape_cast %44 : vector<1x1x32xf32> to vector<1x32xf32>
    %c1_24 = arith.constant 1 : index
    %c0_25 = arith.constant 0 : index
    %c0_26 = arith.constant 0 : index
    %46 = vector.load %arg5[%c1_24, %c0_25, %c0_26] : memref<2x1x32xf32, #tpu.memory_space<vmem>>, vector<1x1x32xf32>
    %47 = vector.shape_cast %46 : vector<1x1x32xf32> to vector<1x32xf32>
    %48 = tpu.concatenate %35, %45 in 1 : vector<1x32xf32>, vector<1x32xf32> -> vector<1x64xf32>
    %49 = arith.truncf %48 : vector<1x64xf32> to vector<1x64xbf16>
    %c1_27 = arith.constant 1 : index
    %c0_28 = arith.constant 0 : index
    %c0_29 = arith.constant 0 : index
    %50 = vector.load %arg2[%c1_27, %c0_28, %c0_29] : memref<2x64x128xbf16, #tpu.memory_space<vmem>>, vector<1x64x128xbf16>
    %51 = vector.shape_cast %50 : vector<1x64x128xbf16> to vector<64x128xbf16>
    %cst_30 = arith.constant dense<0.000000e+00> : vector<1x128xf32>
    %52 = tpu.matmul %49, %51, %cst_30 {dimension_numbers = #tpu.dot_dimension_numbers<[1], [0], [0], [1], [0, 0, 1, 1], [], []>} : vector<1x64xbf16>, vector<64x128xbf16>, vector<1x128xf32> -> vector<1x128xf32>
    %c1_31 = arith.constant 1 : index
    %c0_32 = arith.constant 0 : index
    %c0_33 = arith.constant 0 : index
    %53 = vector.load %arg3[%c1_31, %c0_32, %c0_33] : memref<2x1x128xf32, #tpu.memory_space<vmem>>, vector<1x1x128xf32>
    %54 = vector.shape_cast %53 : vector<1x1x128xf32> to vector<1x128xf32>
    %55 = arith.addf %52, %54 : vector<1x128xf32>
    %56 = vector.extract_strided_slice %55 {offsets = [0, 0], sizes = [1, 32], strides = [1, 1]} : vector<1x128xf32> to vector<1x32xf32>
    %57 = arith.negf %56 : vector<1x32xf32>
    %58 = math.exp %57 : vector<1x32xf32>
    %cst_34 = arith.constant 1.000000e+00 : f32
    %59 = vector.broadcast %cst_34 : f32 to vector<1x32xf32>
    %60 = arith.addf %59, %58 : vector<1x32xf32>
    %61 = arith.divf %59, %60 : vector<1x32xf32>
    %62 = vector.extract_strided_slice %55 {offsets = [0, 32], sizes = [1, 32], strides = [1, 1]} : vector<1x128xf32> to vector<1x32xf32>
    %63 = arith.negf %62 : vector<1x32xf32>
    %64 = math.exp %63 : vector<1x32xf32>
    %cst_35 = arith.constant 1.000000e+00 : f32
    %65 = vector.broadcast %cst_35 : f32 to vector<1x32xf32>
    %66 = arith.addf %65, %64 : vector<1x32xf32>
    %67 = arith.divf %65, %66 : vector<1x32xf32>
    %68 = vector.extract_strided_slice %55 {offsets = [0, 64], sizes = [1, 32], strides = [1, 1]} : vector<1x128xf32> to vector<1x32xf32>
    %69 = math.tanh %68 : vector<1x32xf32>
    %70 = vector.extract_strided_slice %55 {offsets = [0, 96], sizes = [1, 32], strides = [1, 1]} : vector<1x128xf32> to vector<1x32xf32>
    %71 = arith.negf %70 : vector<1x32xf32>
    %72 = math.exp %71 : vector<1x32xf32>
    %cst_36 = arith.constant 1.000000e+00 : f32
    %73 = vector.broadcast %cst_36 : f32 to vector<1x32xf32>
    %74 = arith.addf %73, %72 : vector<1x32xf32>
    %75 = arith.divf %73, %74 : vector<1x32xf32>
    %76 = arith.mulf %67, %47 : vector<1x32xf32>
    %77 = arith.mulf %61, %69 : vector<1x32xf32>
    %78 = arith.addf %76, %77 : vector<1x32xf32>
    %79 = math.tanh %78 : vector<1x32xf32>
    %80 = arith.mulf %75, %79 : vector<1x32xf32>
    %c1_37 = arith.constant 1 : index
    %c0_38 = arith.constant 0 : index
    %c0_39 = arith.constant 0 : index
    %81 = vector.load %arg6[%c1_37, %c0_38, %c0_39] : memref<2x1x32xf32, #tpu.memory_space<vmem>>, vector<1x1x32xf32>
    %82 = vector.shape_cast %81 : vector<1x1x32xf32> to vector<1x32xf32>
    %83 = vector.shape_cast %80 : vector<1x32xf32> to vector<1x1x32xf32>
    tpu.vector_store %arg6[%c1_37, %c0_38, %c0_39], %83 {strides = array<i32>} : memref<2x1x32xf32, #tpu.memory_space<vmem>>, vector<1x1x32xf32>,
    %c1_40 = arith.constant 1 : index
    %c0_41 = arith.constant 0 : index
    %c0_42 = arith.constant 0 : index
    %84 = vector.load %arg7[%c1_40, %c0_41, %c0_42] : memref<2x1x32xf32, #tpu.memory_space<vmem>>, vector<1x1x32xf32>
    %85 = vector.shape_cast %84 : vector<1x1x32xf32> to vector<1x32xf32>
    %86 = vector.shape_cast %78 : vector<1x32xf32> to vector<1x1x32xf32>
    tpu.vector_store %arg7[%c1_40, %c0_41, %c0_42], %86 {strides = array<i32>} : memref<2x1x32xf32, #tpu.memory_space<vmem>>, vector<1x1x32xf32>,
    return
  }
  func.func @transform_0(%arg0: i32) -> (i32, i32) {
    %c0_i32 = arith.constant 0 : i32
    %c0_i32_0 = arith.constant 0 : i32
    %c0_i32_1 = arith.constant 0 : i32
    return %c0_i32, %c0_i32_0 : i32, i32
  }
  func.func @transform_1(%arg0: i32) -> (i32, i32, i32) {
    %c0_i32 = arith.constant 0 : i32
    %c0_i32_0 = arith.constant 0 : i32
    %c0_i32_1 = arith.constant 0 : i32
    %c0_i32_2 = arith.constant 0 : i32
    return %c0_i32, %c0_i32_0, %c0_i32_1 : i32, i32, i32
  }
  func.func @transform_2(%arg0: i32) -> (i32, i32, i32) {
    %c0_i32 = arith.constant 0 : i32
    %c0_i32_0 = arith.constant 0 : i32
    %c0_i32_1 = arith.constant 0 : i32
    %c0_i32_2 = arith.constant 0 : i32
    return %c0_i32, %c0_i32_0, %c0_i32_1 : i32, i32, i32
  }
  func.func @transform_3(%arg0: i32) -> (i32, i32, i32) {
    %c0_i32 = arith.constant 0 : i32
    %c0_i32_0 = arith.constant 0 : i32
    %c0_i32_1 = arith.constant 0 : i32
    %c0_i32_2 = arith.constant 0 : i32
    return %c0_i32, %c0_i32_0, %c0_i32_1 : i32, i32, i32
  }
  func.func @transform_4(%arg0: i32) -> (i32, i32, i32) {
    %c0_i32 = arith.constant 0 : i32
    %c0_i32_0 = arith.constant 0 : i32
    %c0_i32_1 = arith.constant 0 : i32
    %c0_i32_2 = arith.constant 0 : i32
    return %c0_i32, %c0_i32_0, %c0_i32_1 : i32, i32, i32
  }
  func.func @transform_5(%arg0: i32) -> (i32, i32, i32) {
    %c0_i32 = arith.constant 0 : i32
    %c0_i32_0 = arith.constant 0 : i32
    %c0_i32_1 = arith.constant 0 : i32
    %c0_i32_2 = arith.constant 0 : i32
    return %c0_i32, %c0_i32_0, %c0_i32_1 : i32, i32, i32
  }
  func.func @transform_6(%arg0: i32) -> (i32, i32, i32) {
    %c0_i32 = arith.constant 0 : i32
    %c0_i32_0 = arith.constant 0 : i32
    %c0_i32_1 = arith.constant 0 : i32
    %c0_i32_2 = arith.constant 0 : i32
    return %c0_i32, %c0_i32_0, %c0_i32_1 : i32, i32, i32
  }
}

</mosaic_0001>

<bundles_post_ra>
// kernel: stacked_lstm_cell.1
= control target key start
LH: loop header
LB: loop body
LE: loop exit
PB: predicated region body
PF: predicated region fallthrough
CT: control target
= control target key end

     0   :  { %12 = vsyncpa [#allocation3], 0  ;;  %s711_s0 = inlined_call_operand.hbm [shape: f32[1,32], index: 0, kind: input, shape index: {}]   ;;  %s712_s1 = inlined_call_operand.hbm [shape: bf16[2,64,128], index: 1, kind: input, shape index: {}]   ;;  %s713_s2 = inlined_call_operand.vmem [shape: f32[2,1,128], index: 2, kind: input, shape index: {}]   ;;  %s714_s3 = inlined_call_operand.hbm [shape: f32[2,1,32], index: 3, kind: input, shape index: {}]   ;;  %s715_s4 = inlined_call_operand.hbm [shape: f32[2,1,32], index: 4, kind: input, shape index: {}]   ;;  %s716_s5 = inlined_call_operand.hbm [shape: f32[2,1,32], index: 5, kind: output, shape index: {0}]   ;;  %s717_s6 = inlined_call_operand.hbm [shape: f32[2,1,32], index: 6, kind: output, shape index: {1}]  }
   0x1   :  { %13 = vsyncpa [#allocation6], 0 }
   0x2   :  { %14 = vsyncpa [#allocation9], 0 }
   0x3   :  { %15 = vsyncpa [#allocation4], 0 }
   0x4   :  { %16 = vsyncpa [#allocation12], 0  ;;  %s602_s21 = smov [#allocation5]  }
   0x5   :  { %s32_s22 = sshll.u32 %s602_s21, 4  ;;  %s33_s22 = int_to_ptr.vmem [resolvable:$true] %s32_s22 }
   0x6   :  { %s480_s23 = scalar_lea.vmem %s33_s22, 1024  ;;  %p485_p1 = scmp.lt.s32.totalorder %s33_s22, %s33_s22 }
   0x7   :  { %p481_p0 = scmp.ne.s32.totalorder %s33_s22, %s480_s23  ;;  %p486_p2 = scmp.lt.s32.totalorder %s480_s23, %s480_s23 }
   0x9   :  { %p487_p3 = por %p486_p2, %p485_p1 }
   0xb   :  { %p488_p4 = pnand %p487_p3, %p481_p0 }
   0xd   :  { %491 = shalt.err (!%p488_p4)
}
   0xe   :  { %s603_s24 = smov 64   ;;  %s604_s25 = smov 4  }
   0xf   :  { %38 = dma.hbm_to_vmem [thread:$0]  %s712_s1, 1024, %s33_s22, [#allocation6], %s603_s24, %s603_s24, %s604_s25  }
  0x10   :  { %s605_s28 = smov [#allocation2]   ;;  %s606_s30 = smov [#allocation7]  }
  0x11   :  { %s23_s29 = sshll.u32 %s605_s28, 4  ;;  %s46_s7 = sshll.u32 %s606_s30, 4  ;;  %s24_s29 = int_to_ptr.vmem [resolvable:$true] %s23_s29  ;;  %s47_s7 = int_to_ptr.vmem [resolvable:$true] %s46_s7 }
  0x12   :  { %s500_s8 = scalar_lea.vmem %s24_s29, 16  ;;  %s504_s9 = scalar_lea.vmem %s24_s29, 32 }
  0x13   :  { %p501_p5 = scmp.ne.s32.totalorder %s24_s29, %s500_s8  ;;  %p505_p6 = scmp.lt.s32.totalorder %s24_s29, %s24_s29 }
  0x14   :  { %p506_p7 = scmp.lt.s32.totalorder %s504_s9, %s500_s8 }
  0x16   :  { %p507_p8 = por %p506_p7, %p505_p6 }
  0x18   :  { %p508_p9 = pnand %p507_p8, %p501_p5 }
  0x1a   :  { %511 = shalt.err (!%p508_p9)
}
  0x1b   :  { %26 = dma.hbm_to_vmem [thread:$0]  %s711_s0, 16, %s24_s29, [#allocation3]  }
  0x1c   :  { %s520_s12 = scalar_lea.vmem %s47_s7, 32  ;;  %p525_p11 = scmp.lt.s32.totalorder %s47_s7, %s47_s7 }
  0x1d   :  { %p521_p10 = scmp.ne.s32.totalorder %s47_s7, %s520_s12  ;;  %p526_p12 = scmp.lt.s32.totalorder %s520_s12, %s520_s12 }
  0x1f   :  { %p527_p13 = por %p526_p12, %p525_p11 }
  0x21   :  { %p528_p0 = pnand %p527_p13, %p521_p10 }
  0x23   :  { %531 = shalt.err (!%p528_p0)
}
  0x24   :  { %s607_s1 = smov 16   ;;  %s608_s13 = smov 1  }
  0x25   :  { %52 = dma.hbm_to_vmem [thread:$0]  %s714_s3, 32, %s47_s7, [#allocation6], %s607_s1, %s607_s1, %s608_s13  }
  0x26   :  { %s609_s16 = smov [#allocation8]  }
  0x27   :  { %s58_s17 = sshll.u32 %s609_s16, 4  ;;  %s59_s17 = int_to_ptr.vmem [resolvable:$true] %s58_s17 }
  0x28   :  { %s540_s0 = scalar_lea.vmem %s59_s17, 32  ;;  %p545_p2 = scmp.lt.s32.totalorder %s59_s17, %s59_s17 }
  0x29   :  { %p541_p1 = scmp.ne.s32.totalorder %s59_s17, %s540_s0  ;;  %p546_p3 = scmp.lt.s32.totalorder %s540_s0, %s540_s0 }
  0x2b   :  { %p547_p4 = por %p546_p3, %p545_p2 }
  0x2d   :  { %p548_p5 = pnand %p547_p4, %p541_p1 }
  0x2f   :  { %551 = shalt.err (!%p548_p5)
}
  0x30   :  { %64 = dma.hbm_to_vmem [thread:$0]  %s715_s4, 32, %s59_s17, [#allocation9], %s607_s1, %s607_s1, %s608_s13  }
  0x31   :  { %592 = dma.done.wait [#allocation3], 16  }
  0x32   :  { %593 = vsyncadd [#allocation3], 4294967280 }
  0x33   :  { %594 = dma.done.wait [#allocation6], 1056  }
  0x34   :  { %595 = vsyncadd [#allocation6], 4294966240 }
  0x35   :  { %596 = dma.done.wait [#allocation9], 32  }
  0x36   :  { %597 = vsyncadd [#allocation9], 4294967264  ;;  %v610_v0 = vmov 0.0   ;;  %vm611_vm0 = vmmov 0   ;;  %v383_v1 = vld [vmem:[#allocation7] ss:$0 sm:$0xff] }
  0x37   :  { %410 = vmatprep.subr.bf16.mxu0 %v610_v0  ;;  %418 = vmatprep.mubr.msk.bf16.mxu0 %vm611_vm0, %v610_v0  ;;  %s612_s3 = smov 32   ;;  %v448_v2 = vld [vmem:[#allocation5 + $0x18] sm:$0xff]   ;;  %v449_v3 = vld [vmem:[#allocation5 + $0x10] sm:$0xff]   ;;  %v390_v4 = vld [vmem:[#allocation8] ss:$0 sm:$0xff]  ;;  %vm89_vm1 = vcmask 261120  }
  0x38   :  { %422 = vmatprep.subr.bf16.mxu1 %v610_v0  ;;  %430 = vmatprep.mubr.msk.bf16.mxu1 %vm611_vm0, %v610_v0  ;;  %v450_v5 = vld [vmem:[#allocation5 + $0x8] sm:$0xff]   ;;  %v451_v6 = vld [vmem:[#allocation5] sm:$0xff]   ;;  %v78_v7 = vld [vmem:[#allocation2] sm:$0x1]  ;;  %vm125_vm2 = vcmask 523264   ;;  %s613_s21 = smov 96  }
  0x39   :  { %86 = vrot.lane.b32.xlu0 %v383_v1, %s612_s3  ;;  %411 = vmatpush3.bf16.msra.mxu0 %v448_v2  ;;  %v100_v11 = vld [vmem:[%s713_s2] sm:$0x1]  ;;  %v391_v24 = vld [vmem:[#allocation7 + $0x1] ss:$0 sm:$0xff]  ;;  %v399_v26 = vld [vmem:[#allocation8 + $0x1] ss:$0 sm:$0xff] }
  0x3a   :  { %412 = vmatprep.subr.bf16.mxu0 %v610_v0  ;;  %181 = vrot.lane.b32.xlu1 %v390_v4, %s612_s3  ;;  %v452_v25 = vld [vmem:[#allocation5 + $0x38] sm:$0xff]   ;;  %v453_v27 = vld [vmem:[#allocation5 + $0x30] sm:$0xff]   ;;  %v454_v28 = vld [vmem:[#allocation5 + $0x28] sm:$0xff]   ;;  %vm205_vm3 = vcmask 253952  }
  0x3b   :  { %423 = vmatpush3.bf16.msra.mxu1 %v452_v25  ;;  %v455_v29 = vld [vmem:[#allocation5 + $0x20] sm:$0xff]   ;;  %v392_v43 = vld [vmem:[%s713_s2 + $0x1] sm:$0x1]  ;;  %s614_s2 = smov [#allocation11]  }
  0x3c   :  { %424 = vmatprep.subr.bf16.mxu1 %v610_v0  ;;  %s365_s25 = sshll.u32 %s614_s2, 4  ;;  %s366_s25 = int_to_ptr.vmem [resolvable:$true] %s365_s25 }
  0x3d   :  { %413 = vmatpush3.bf16.msra.mxu0 %v449_v3  ;;  %s552_s26 = scalar_lea.vmem %s366_s25, 32  ;;  %p557_p7 = scmp.lt.s32.totalorder %s366_s25, %s366_s25 }
  0x3e   :  { %414 = vmatprep.subr.bf16.mxu0 %v610_v0  ;;  %p553_p6 = scmp.ne.s32.totalorder %s366_s25, %s552_s26  ;;  %p558_p8 = scmp.lt.s32.totalorder %s552_s26, %s552_s26 }
  0x3f   :  { %425 = vmatpush3.bf16.msra.mxu1 %v453_v27 }
  0x40   :  { %426 = vmatprep.subr.bf16.mxu1 %v610_v0  ;;  %p559_p9 = por %p558_p8, %p557_p7 }
  0x41   :  { %415 = vmatpush3.bf16.msra.mxu0 %v450_v5 }
  0x42   :  { %416 = vmatprep.subr.bf16.mxu0 %v610_v0  ;;  %p560_p10 = pnand %p559_p9, %p553_p6 }
  0x43   :  { %427 = vmatpush3.bf16.msra.mxu1 %v454_v28 }
  0x44   :  { %428 = vmatprep.subr.bf16.mxu1 %v610_v0 }
  0x45   :  { %417 = vmatpush3.bf16.msra.mxu0 %v451_v6 }
  0x47   :  { %429 = vmatpush3.bf16.msra.mxu1 %v455_v29 }
  0xab   :  { %v87_v8 = vpop.permute.xlu0 %86 }
  0xac   :  { %v90_v9 = vsel %vm89_vm1, %v78_v7, %v87_v8  ;;  %v182_v30 = vpop.permute.xlu1 %181 }
  0xad   :  { %v91_v10 = vpack.c.bf16 %v90_v9, %v90_v9 }
  0xaf   :  { %419 = vmatmul.mubr.msk.bf16.vlgmr.msra.gmra.mxu0 %vm125_vm2, %v91_v10 }
 0x16f   :  { %v163_v12 = vpop.f32.mrf.mxu0 }
 0x170   :  { %v164_v13 = vadd.f32 %v163_v12, %v100_v11 }
 0x171   :  { %v420_v14 = vpop.f32.mrf.mxu0 }
 0x172   :  { %456 = vtanh.f32 %v164_v13  ;;  %v389_v18 = vmul.f32 -1.442695, %v164_v13 }
 0x173   :  { %v166_v15 = vpop.f32.mrf.mxu0 }
 0x174   :  { %458 = vpow2.f32 %v389_v18 }
 0x175   :  { %v421_v16 = vpop.f32.mrf.mxu0 }
 0x17f   :  { %v457_v17 = vpop.eup %456 }
 0x180   :  { %186 = vrot.lane.b32.xlu0 %v457_v17, %s603_s24 }
 0x181   :  { %v459_v19 = vpop.eup %458 }
 0x182   :  { %v172_v20 = vadd.f32 1.0, %v459_v19 }
 0x184   :  { %460 = vrcp.f32 %v172_v20 }
 0x191   :  { %v461_v21 = vpop.eup %460 }
 0x192   :  { %v184_v31 = vmul.f32 %v461_v21, %v182_v30 }
 0x1f2   :  { %v187_v22 = vpop.permute.xlu0 %186 }
 0x1f3   :  { %v189_v23 = vmul.f32 %v461_v21, %v187_v22 }
 0x1f5   :  { %191 = vrot.lane.b32.xlu1 %v189_v23, %s612_s3 }
 0x1f9   :  { %221 = vrot.lane.b32.xlu1 %v391_v24, %s612_s3 }
 0x1fd   :  { %316 = vrot.lane.b32.xlu1 %v399_v26, %s612_s3 }
 0x267   :  { %v192_v32 = vpop.permute.xlu1 %191 }
 0x268   :  { %v194_v33 = vadd.f32 %v192_v32, %v184_v31 }
 0x26a   :  { %462 = vtanh.f32 %v194_v33  ;;  %208 = vrot.lane.b32.xlu0 %v194_v33, %s613_s21 }
 0x26b   :  { %v222_v35 = vpop.permute.xlu1 %221 }
 0x26f   :  { %v317_v39 = vpop.permute.xlu1 %316 }
 0x277   :  { %v463_v34 = vpop.eup %462 }
 0x278   :  { %197 = vrot.lane.b32.xlu1 %v463_v34, %s603_s24 }
 0x2dc   :  { %v209_v36 = vpop.permute.xlu0 %208 }
 0x2dd   :  { %211 = vst.msk [vmem:[#allocation11] sm:$0x1] %vm205_vm3, %v209_v36  ;;  %v224_v37 = vsel %vm89_vm1, %v209_v36, %v222_v35 }
 0x2de   :  { %v225_v38 = vpack.c.bf16 %v224_v37, %v224_v37 }
 0x2e0   :  { %431 = vmatmul.mubr.msk.bf16.vlgmr.msra.gmra.mxu1 %vm125_vm2, %v225_v38 }
 0x2ea   :  { %v198_v40 = vpop.permute.xlu1 %197 }
 0x2eb   :  { %v200_v41 = vmul.f32 %v461_v21, %v198_v40 }
 0x2ed   :  { %202 = vrot.lane.b32.xlu1 %v200_v41, %s612_s3 }
 0x35f   :  { %v203_v42 = vpop.permute.xlu1 %202 }
 0x360   :  { %206 = vst.msk [vmem:[#allocation10] sm:$0x1] %vm205_vm3, %v203_v42 }
 0x3a0   :  { %v298_v44 = vpop.f32.mrf.mxu1 }
 0x3a1   :  { %v299_v45 = vadd.f32 %v392_v43, %v298_v44 }
 0x3a2   :  { %v432_v46 = vpop.f32.mrf.mxu1 }
 0x3a3   :  { %464 = vtanh.f32 %v299_v45  ;;  %v398_v50 = vmul.f32 -1.442695, %v299_v45 }
 0x3a4   :  { %v301_v47 = vpop.f32.mrf.mxu1 }
 0x3a5   :  { %466 = vpow2.f32 %v398_v50 }
 0x3a6   :  { %v433_v48 = vpop.f32.mrf.mxu1 }
 0x3b0   :  { %v465_v49 = vpop.eup %464 }
 0x3b1   :  { %321 = vrot.lane.b32.xlu0 %v465_v49, %s603_s24 }
 0x3b2   :  { %v467_v51 = vpop.eup %466 }
 0x3b3   :  { %v307_v52 = vadd.f32 1.0, %v467_v51 }
 0x3b5   :  { %468 = vrcp.f32 %v307_v52 }
 0x3c2   :  { %v469_v53 = vpop.eup %468 }
 0x3c3   :  { %v319_v56 = vmul.f32 %v469_v53, %v317_v39 }
 0x423   :  { %v322_v54 = vpop.permute.xlu0 %321 }
 0x424   :  { %v324_v55 = vmul.f32 %v469_v53, %v322_v54 }
 0x426   :  { %326 = vrot.lane.b32.xlu0 %v324_v55, %s612_s3 }
 0x498   :  { %v327_v57 = vpop.permute.xlu0 %326 }
 0x499   :  { %v329_v58 = vadd.f32 %v327_v57, %v319_v56 }
 0x49b   :  { %470 = vtanh.f32 %v329_v58  ;;  %343 = vrot.lane.b32.xlu1 %v329_v58, %s613_s21 }
 0x4a8   :  { %v471_v59 = vpop.eup %470 }
 0x4a9   :  { %332 = vrot.lane.b32.xlu0 %v471_v59, %s603_s24 }
 0x50d   :  { %v344_v60 = vpop.permute.xlu1 %343 }
 0x50e   :  { %347 = vst.msk [vmem:[#allocation11 + $0x1] sm:$0x1] %vm205_vm3, %v344_v60 }
 0x50f   :  { %563 = shalt.err (!%p560_p10)
}
 0x510   :  { %371 = dma.vmem_to_hbm [thread:$0]  %s366_s25, 32, %s717_s6, [#allocation12], %s607_s1, %s607_s1, %s608_s13  }
 0x511   :  { %s615_s24 = smov [#allocation10]  }
 0x512   :  { %s353_s29 = sshll.u32 %s615_s24, 4  ;;  %s354_s29 = int_to_ptr.vmem [resolvable:$true] %s353_s29 }
 0x513   :  { %s572_s30 = scalar_lea.vmem %s354_s29, 32  ;;  %p577_p12 = scmp.lt.s32.totalorder %s354_s29, %s354_s29 }
 0x514   :  { %p573_p11 = scmp.ne.s32.totalorder %s354_s29, %s572_s30  ;;  %p578_p13 = scmp.lt.s32.totalorder %s572_s30, %s572_s30 }
 0x516   :  { %p579_p0 = por %p578_p13, %p577_p12 }
 0x518   :  { %p580_p1 = pnand %p579_p0, %p573_p11 }
 0x51b   :  { %v333_v61 = vpop.permute.xlu0 %332 }
 0x51c   :  { %v335_v62 = vmul.f32 %v469_v53, %v333_v61 }
 0x51e   :  { %337 = vrot.lane.b32.xlu0 %v335_v62, %s612_s3 }
 0x590   :  { %v338_v63 = vpop.permute.xlu0 %337 }
 0x591   :  { %341 = vst.msk [vmem:[#allocation10 + $0x1] sm:$0x1] %vm205_vm3, %v338_v63 }
 0x592   :  { %583 = shalt.err (!%p580_p1)
}
 0x593   :  { %359 = dma.vmem_to_hbm [thread:$0]  %s354_s29, 32, %s716_s5, [#allocation4], %s607_s1, %s607_s1, %s608_s13  }
 0x594   :  { %598 = dma.done.wait [#allocation4], 32  }
 0x595   :  { %599 = vsyncadd [#allocation4], 4294967264 }
 0x596   :  { %600 = dma.done.wait [#allocation12], 32  }
 0x597   :  { %601 = vsyncadd [#allocation12], 4294967264 }
 0x598   :  { %378 = vsyncpa [#allocation3], 1 }
 0x599   :  { %379 = vsyncpa [#allocation6], 1 }
 0x59a   :  { %380 = vsyncpa [#allocation9], 1 }
 0x59b   :  { %381 = vsyncpa [#allocation4], 1 }
 0x59c   :  { %382 = vsyncpa [#allocation12], 1 }

</bundles_post_ra>
